<compile_context>
chip_gen: v7x
topology: tpu7x:2x2x1
jax: 0.10.0
libtpu: 0.0.40
codegen_flags: <defaults>
</compile_context>

<pallas_src>
import jax
import jax.numpy as jnp
from jax.experimental import pallas as pl
from jax.experimental.pallas import tpu as pltpu


def _round_up(x, m):
    return ((x + m - 1) // m) * m


def _pick_tile(dim, preferred):
    """Largest preferred tile that evenly divides `dim` (dim is a mult of 128)."""
    for t in preferred:
        if dim % t == 0:
            return t
    return 128


def _matmul_kernel(a_ref, b_ref, o_ref, acc_ref):
    """One (TM, TN) output tile, accumulated over the K grid axis in f32 VMEM."""

    @pl.when(pl.program_id(2) == 0)
    def _():
        acc_ref[...] = jnp.zeros_like(acc_ref)

    acc_ref[...] += jnp.dot(
        a_ref[...], b_ref[...], preferred_element_type=jnp.float32
    )

    @pl.when(pl.program_id(2) == pl.num_programs(2) - 1)
    def _():
        o_ref[...] = acc_ref[...].astype(o_ref.dtype)


def _tiled_matmul(a, b, out_dtype):
    """a: (M, K), b: (K, N).  All dims must already be multiples of 128."""
    m, k = a.shape
    k2, n = b.shape
    assert k == k2

    tm = _pick_tile(m, (512, 256, 128))
    tk = _pick_tile(k, (512, 256, 128))
    tn = _pick_tile(n, (256, 128))

    grid = (m // tm, n // tn, k // tk)

    return pl.pallas_call(
        _matmul_kernel,
        out_shape=jax.ShapeDtypeStruct((m, n), out_dtype),
        grid=grid,
        in_specs=[
            pl.BlockSpec((tm, tk), lambda i, j, kk: (i, kk)),
            pl.BlockSpec((tk, tn), lambda i, j, kk: (kk, j)),
        ],
        out_specs=pl.BlockSpec((tm, tn), lambda i, j, kk: (i, j)),
        scratch_shapes=[pltpu.VMEM((tm, tn), jnp.float32)],
        compiler_params=pltpu.CompilerParams(
            dimension_semantics=("parallel", "parallel", "arbitrary"),
        ),
    )(a, b)


def graph_convolution(adjacency, input_feature, weight, compute_dtype=None):
    """output = adjacency @ (input_feature @ weight)."""
    n, d_in = input_feature.shape
    d_out = weight.shape[1]
    assert adjacency.shape == (n, n)
    assert weight.shape[0] == d_in

    out_dtype = input_feature.dtype

    # Optional reduced-precision streaming of the mem-bound adjacency / features.
    if compute_dtype is not None:
        adjacency = adjacency.astype(compute_dtype)
        input_feature = input_feature.astype(compute_dtype)
        weight = weight.astype(compute_dtype)

    # Pad every dim to a multiple of 128: lane-dense output, (8,128)-aligned
    # blocks, and padded zeros do not change the matmul results.
    n_p = _round_up(n, 128)
    d_in_p = _round_up(d_in, 128)
    d_out_p = _round_up(d_out, 128)

    a_p = jnp.pad(adjacency, ((0, n_p - n), (0, n_p - n)))
    x_p = jnp.pad(input_feature, ((0, n_p - n), (0, d_in_p - d_in)))
    w_p = jnp.pad(weight, ((0, d_in_p - d_in), (0, d_out_p - d_out)))

    # Stage 1 (cheap, O(N*D_in*D_out)): support = X @ W
    support = _tiled_matmul(x_p, w_p, out_dtype=a_p.dtype)
    # Stage 2 (dominant, O(N^2*D_out)): out = A @ support
    out_p = _tiled_matmul(a_p, support, out_dtype=out_dtype)

    return out_p[:n, :d_out]


if __name__ == "__main__":
    # Small deterministic example matching the module: N=8 nodes,
    # input_dim=32, output_dim=16.
    N, D_IN, D_OUT = 8, 32, 16

    key = jax.random.PRNGKey(0)
    k_adj, k_x, k_w = jax.random.split(key, 3)

    adj_raw = jax.random.uniform(k_adj, (N, N), dtype=jnp.float32)
    adjacency = (adj_raw + adj_raw.T) * 0.5

    input_feature = jax.random.normal(k_x, (N, D_IN), dtype=jnp.float32)
    weight = jax.random.normal(k_w, (D_IN, D_OUT), dtype=jnp.float32) * 0.1

    gcn = jax.jit(graph_convolution)
    out = gcn(adjacency, input_feature, weight)
    out = jax.block_until_ready(out)

    # Reference check against plain JAX.
    ref = adjacency @ (input_feature @ weight)
    assert out.shape == (N, D_OUT)
    assert jnp.allclose(out, ref, atol=1e-4, rtol=1e-4), "mismatch vs reference"

    print("KERNEL_OK")
</pallas_src>

<mosaic_0001>
module attributes {stable_mosaic.version = 11 : i64} {
  func.func @_matmul_kernel(%arg0: i32, %arg1: i32, %arg2: i32, %arg3: memref<128x128xf32, #tpu.memory_space<vmem>>, %arg4: memref<128x128xf32, #tpu.memory_space<vmem>>, %arg5: memref<128x128xf32, #tpu.memory_space<vmem>>, %arg6: memref<128x128xf32, #tpu.memory_space<vmem>>) attributes {dimension_semantics = [#tpu.dimension_semantics<parallel>, #tpu.dimension_semantics<parallel>, #tpu.dimension_semantics<arbitrary>], iteration_bounds = array<i64: 1, 1, 1>, scalar_prefetch = 0 : i64, scratch_operands = 1 : i64, tpu.core_type = #tpu.core_type<tc>, window_params = [{transform_indices = @transform_0, window_bounds = array<i64: 128, 128>}, {transform_indices = @transform_1, window_bounds = array<i64: 128, 128>}, {transform_indices = @transform_2, window_bounds = array<i64: 128, 128>}]} {
    %c0_i32 = arith.constant 0 : i32
    %0 = arith.cmpi eq, %arg2, %c0_i32 : i32
    %1 = arith.extui %0 : i1 to i32
    %c0_i32_0 = arith.constant 0 : i32
    %2 = arith.cmpi ne, %1, %c0_i32_0 : i32
    scf.if %2 {
      %cst_10 = arith.constant 0.000000e+00 : f32
      %12 = vector.broadcast %cst_10 : f32 to vector<128x128xf32>
      %c0_11 = arith.constant 0 : index
      %c0_12 = arith.constant 0 : index
      %13 = vector.load %arg6[%c0_11, %c0_12] : memref<128x128xf32, #tpu.memory_space<vmem>>, vector<128x128xf32>
      tpu.vector_store %arg6[%c0_11, %c0_12], %12 {strides = array<i32>} : memref<128x128xf32, #tpu.memory_space<vmem>>, vector<128x128xf32>,
    } else {
    }
    %c0 = arith.constant 0 : index
    %c0_1 = arith.constant 0 : index
    %3 = vector.load %arg6[%c0, %c0_1] : memref<128x128xf32, #tpu.memory_space<vmem>>, vector<128x128xf32>
    %c0_2 = arith.constant 0 : index
    %c0_3 = arith.constant 0 : index
    %4 = vector.load %arg3[%c0_2, %c0_3] : memref<128x128xf32, #tpu.memory_space<vmem>>, vector<128x128xf32>
    %c0_4 = arith.constant 0 : index
    %c0_5 = arith.constant 0 : index
    %5 = vector.load %arg4[%c0_4, %c0_5] : memref<128x128xf32, #tpu.memory_space<vmem>>, vector<128x128xf32>
    %cst = arith.constant dense<0.000000e+00> : vector<128x128xf32>
    %6 = tpu.matmul %4, %5, %cst {dimension_numbers = #tpu.dot_dimension_numbers<[1], [0], [0], [1], [0, 0, 1, 1], [], []>} : vector<128x128xf32>, vector<128x128xf32>, vector<128x128xf32> -> vector<128x128xf32>
    %7 = arith.addf %3, %6 : vector<128x128xf32>
    %c0_6 = arith.constant 0 : index
    %c0_7 = arith.constant 0 : index
    %8 = vector.load %arg6[%c0_6, %c0_7] : memref<128x128xf32, #tpu.memory_space<vmem>>, vector<128x128xf32>
    tpu.vector_store %arg6[%c0_6, %c0_7], %7 {strides = array<i32>} : memref<128x128xf32, #tpu.memory_space<vmem>>, vector<128x128xf32>,
    %c0_i32_8 = arith.constant 0 : i32
    %9 = arith.cmpi eq, %arg2, %c0_i32_8 : i32
    %10 = arith.extui %9 : i1 to i32
    %c0_i32_9 = arith.constant 0 : i32
    %11 = arith.cmpi ne, %10, %c0_i32_9 : i32
    scf.if %11 {
      %c0_10 = arith.constant 0 : index
      %c0_11 = arith.constant 0 : index
      %12 = vector.load %arg6[%c0_10, %c0_11] : memref<128x128xf32, #tpu.memory_space<vmem>>, vector<128x128xf32>
      %c0_12 = arith.constant 0 : index
      %c0_13 = arith.constant 0 : index
      %13 = vector.load %arg5[%c0_12, %c0_13] : memref<128x128xf32, #tpu.memory_space<vmem>>, vector<128x128xf32>
      tpu.vector_store %arg5[%c0_12, %c0_13], %12 {strides = array<i32>} : memref<128x128xf32, #tpu.memory_space<vmem>>, vector<128x128xf32>,
    } else {
    }
    return
  }
  func.func @transform_0(%arg0: i32, %arg1: i32, %arg2: i32) -> (i32, i32) {
    %c0_i32 = arith.constant 0 : i32
    return %arg0, %arg2 : i32, i32
  }
  func.func @transform_1(%arg0: i32, %arg1: i32, %arg2: i32) -> (i32, i32) {
    %c0_i32 = arith.constant 0 : i32
    return %arg2, %arg1 : i32, i32
  }
  func.func @transform_2(%arg0: i32, %arg1: i32, %arg2: i32) -> (i32, i32) {
    %c0_i32 = arith.constant 0 : i32
    return %arg0, %arg1 : i32, i32
  }
}

</mosaic_0001>

<bundles_post_ra>
// kernel: graph_convolution.2
= control target key start
LH: loop header
LB: loop body
LE: loop exit
PB: predicated region body
PF: predicated region fallthrough
CT: control target
= control target key end

     0   :  { %s590_s1 = inlined_call_operand.vmem [shape: f32[128,128], index: 1, kind: input, shape index: {}]   ;;  %s591_s0 = inlined_call_operand.vmem [shape: f32[128,128], index: 0, kind: input, shape index: {}]   ;;  %s592_s2 = inlined_call_operand.vmem [shape: f32[128,128], index: 2, kind: output, shape index: {}]  }
   0x1   :  { %v63_v0 = vld [vmem:[%s590_s1] sm:$0xff]  ;;  %v64_v1 = vld [vmem:[%s590_s1 + $0x8] sm:$0xff]  ;;  %v65_v2 = vld [vmem:[%s590_s1 + $0x10] sm:$0xff] }
   0x2   :  { %v383_v3 = vpack.c.bf16 %v64_v1, %v63_v0  ;;  %v66_v4 = vld [vmem:[%s590_s1 + $0x18] sm:$0xff]  ;;  %v67_v6 = vld [vmem:[%s590_s1 + $0x20] sm:$0xff]  ;;  %v68_v7 = vld [vmem:[%s590_s1 + $0x28] sm:$0xff] }
   0x3   :  { %v387_v5 = vpack.c.bf16 %v66_v4, %v65_v2  ;;  %v391_v8 = vpack.c.bf16 %v68_v7, %v67_v6  ;;  %v47_v9 = vld [vmem:[%s591_s0] sm:$0xff]  ;;  %v69_v11 = vld [vmem:[%s590_s1 + $0x30] sm:$0xff]  ;;  %v70_v12 = vld [vmem:[%s590_s1 + $0x38] sm:$0xff] }
   0x4   :  { %384 = vmatprep.subr.bf16.mxu0 %v383_v3  ;;  %415 = vmatprep.subr.bf16.mxu1 %v383_v3  ;;  %v55_v10 = vld [vmem:[%s591_s0 + $0x40] sm:$0xff]  ;;  %v395_v13 = vpack.c.bf16 %v70_v12, %v69_v11  ;;  %v72_v15 = vld [vmem:[%s590_s1 + $0x48] sm:$0xff]  ;;  %v73_v17 = vld [vmem:[%s590_s1 + $0x50] sm:$0xff] }
   0x5   :  { %386 = vmatpush3.bf16.msra.mxu0 %v383_v3  ;;  %423 = vmatpush3.bf16.msra.mxu1 %v383_v3  ;;  %v71_v14 = vld [vmem:[%s590_s1 + $0x40] sm:$0xff]  ;;  %v74_v18 = vld [vmem:[%s590_s1 + $0x58] sm:$0xff]  ;;  %v76_v21 = vld [vmem:[%s590_s1 + $0x68] sm:$0xff] }
   0x6   :  { %388 = vmatprep.subr.bf16.mxu0 %v387_v5  ;;  %416 = vmatprep.subr.bf16.mxu1 %v387_v5  ;;  %v399_v16 = vpack.c.bf16 %v72_v15, %v71_v14  ;;  %v403_v19 = vpack.c.bf16 %v74_v18, %v73_v17  ;;  %v75_v20 = vld [vmem:[%s590_s1 + $0x60] sm:$0xff]  ;;  %v77_v23 = vld [vmem:[%s590_s1 + $0x70] sm:$0xff]  ;;  %v78_v24 = vld [vmem:[%s590_s1 + $0x78] sm:$0xff] }
   0x7   :  { %359 = vmatprep.mubr.f32.mxu0 %v47_v9  ;;  %371 = vmatprep.mubr.f32.mxu1 %v55_v10  ;;  %v407_v22 = vpack.c.bf16 %v76_v21, %v75_v20  ;;  %v411_v25 = vpack.c.bf16 %v78_v24, %v77_v23  ;;  %v48_v26 = vld [vmem:[%s591_s0 + $0x8] sm:$0xff]  ;;  %v49_v28 = vld [vmem:[%s591_s0 + $0x10] sm:$0xff]  ;;  %v50_v30 = vld [vmem:[%s591_s0 + $0x18] sm:$0xff] }
   0x8   :  { %v56_v27 = vld [vmem:[%s591_s0 + $0x48] sm:$0xff]  ;;  %v57_v29 = vld [vmem:[%s591_s0 + $0x50] sm:$0xff]  ;;  %v58_v31 = vld [vmem:[%s591_s0 + $0x58] sm:$0xff] }
   0x9   :  { %390 = vmatpush3.bf16.msra.mxu0 %v387_v5  ;;  %424 = vmatpush3.bf16.msra.mxu1 %v387_v5  ;;  %v51_v32 = vld [vmem:[%s591_s0 + $0x20] sm:$0xff]  ;;  %v52_v34 = vld [vmem:[%s591_s0 + $0x28] sm:$0xff]  ;;  %v53_v36 = vld [vmem:[%s591_s0 + $0x30] sm:$0xff] }
   0xa   :  { %392 = vmatprep.subr.bf16.mxu0 %v391_v8  ;;  %417 = vmatprep.subr.bf16.mxu1 %v391_v8  ;;  %v59_v33 = vld [vmem:[%s591_s0 + $0x60] sm:$0xff]  ;;  %v60_v35 = vld [vmem:[%s591_s0 + $0x68] sm:$0xff]  ;;  %v61_v37 = vld [vmem:[%s591_s0 + $0x70] sm:$0xff] }
   0xb   :  { %v54_v38 = vld [vmem:[%s591_s0 + $0x38] sm:$0xff] }
   0xc   :  { %v62_v39 = vld [vmem:[%s591_s0 + $0x78] sm:$0xff] }
   0xd   :  { %394 = vmatpush3.bf16.msra.mxu0 %v391_v8  ;;  %425 = vmatpush3.bf16.msra.mxu1 %v391_v8 }
   0xe   :  { %396 = vmatprep.subr.bf16.mxu0 %v395_v13  ;;  %418 = vmatprep.subr.bf16.mxu1 %v395_v13 }
  0x11   :  { %398 = vmatpush3.bf16.msra.mxu0 %v395_v13  ;;  %426 = vmatpush3.bf16.msra.mxu1 %v395_v13 }
  0x12   :  { %400 = vmatprep.subr.bf16.mxu0 %v399_v16  ;;  %419 = vmatprep.subr.bf16.mxu1 %v399_v16 }
  0x15   :  { %402 = vmatpush3.bf16.msra.mxu0 %v399_v16  ;;  %427 = vmatpush3.bf16.msra.mxu1 %v399_v16 }
  0x16   :  { %404 = vmatprep.subr.bf16.mxu0 %v403_v19  ;;  %420 = vmatprep.subr.bf16.mxu1 %v403_v19 }
  0x19   :  { %406 = vmatpush3.bf16.msra.mxu0 %v403_v19  ;;  %428 = vmatpush3.bf16.msra.mxu1 %v403_v19 }
  0x1a   :  { %408 = vmatprep.subr.bf16.mxu0 %v407_v22  ;;  %421 = vmatprep.subr.bf16.mxu1 %v407_v22 }
  0x1d   :  { %410 = vmatpush3.bf16.msra.mxu0 %v407_v22  ;;  %429 = vmatpush3.bf16.msra.mxu1 %v407_v22 }
  0x1e   :  { %412 = vmatprep.subr.bf16.mxu0 %v411_v25  ;;  %422 = vmatprep.subr.bf16.mxu1 %v411_v25 }
  0x21   :  { %414 = vmatpush3.bf16.msra.mxu0 %v411_v25  ;;  %430 = vmatpush3.bf16.msra.mxu1 %v411_v25 }
  0x24   :  { %360 = vmatmul.mubr.f32.vlgmr.msra.gmra.mrb[0].mxu0 %v48_v26  ;;  %372 = vmatmul.mubr.f32.vlgmr.msra.gmra.mrb[0].mxu1 %v56_v27 }
  0x25   :  { %362 = vmatprep.mubr.f32.mxu0 %v49_v28  ;;  %374 = vmatprep.mubr.f32.mxu1 %v57_v29 }
  0x28   :  { %363 = vmatmul.mubr.f32.gmra.mrb[2].mxu0 %v50_v30  ;;  %375 = vmatmul.mubr.f32.gmra.mrb[2].mxu1 %v58_v31 }
  0x29   :  { %365 = vmatprep.mubr.f32.mxu0 %v51_v32  ;;  %377 = vmatprep.mubr.f32.mxu1 %v59_v33 }
  0x2c   :  { %366 = vmatmul.mubr.f32.gmra.mrb[4].mxu0 %v52_v34  ;;  %378 = vmatmul.mubr.f32.gmra.mrb[4].mxu1 %v60_v35 }
  0x2d   :  { %368 = vmatprep.mubr.f32.mxu0 %v53_v36  ;;  %380 = vmatprep.mubr.f32.mxu1 %v61_v37 }
  0x30   :  { %369 = vmatmul.mubr.f32.gmra.mrb[6].mxu0 %v54_v38  ;;  %381 = vmatmul.mubr.f32.gmra.mrb[6].mxu1 %v62_v39 }
  0xf7   :  { %v361_v40 = vpop.f32.mrb[0].mxu0  ;;  %v373_v41 = vpop.f32.mrb[0].mxu1 }
  0xf8   :  { %276 = vst [vmem:[%s592_s2 + $0x8] sm:$0xff] %v361_v40  ;;  %284 = vst [vmem:[%s592_s2 + $0x48] sm:$0xff] %v373_v41  ;;  %v145_v42 = vpop.f32.mrb[1].mxu0  ;;  %v185_v43 = vpop.f32.mrb[1].mxu1 }
  0xf9   :  { %275 = vst [vmem:[%s592_s2] sm:$0xff] %v145_v42  ;;  %283 = vst [vmem:[%s592_s2 + $0x40] sm:$0xff] %v185_v43 }
  0xfb   :  { %v364_v44 = vpop.f32.mrb[2].mxu0  ;;  %v376_v45 = vpop.f32.mrb[2].mxu1 }
  0xfc   :  { %278 = vst [vmem:[%s592_s2 + $0x18] sm:$0xff] %v364_v44  ;;  %286 = vst [vmem:[%s592_s2 + $0x58] sm:$0xff] %v376_v45  ;;  %v155_v46 = vpop.f32.mrb[3].mxu0  ;;  %v195_v47 = vpop.f32.mrb[3].mxu1 }
  0xfd   :  { %277 = vst [vmem:[%s592_s2 + $0x10] sm:$0xff] %v155_v46  ;;  %285 = vst [vmem:[%s592_s2 + $0x50] sm:$0xff] %v195_v47 }
  0xff   :  { %v367_v48 = vpop.f32.mrb[4].mxu0  ;;  %v379_v49 = vpop.f32.mrb[4].mxu1 }
 0x100   :  { %280 = vst [vmem:[%s592_s2 + $0x28] sm:$0xff] %v367_v48  ;;  %288 = vst [vmem:[%s592_s2 + $0x68] sm:$0xff] %v379_v49  ;;  %v165_v50 = vpop.f32.mrb[5].mxu0  ;;  %v205_v51 = vpop.f32.mrb[5].mxu1 }
 0x101   :  { %279 = vst [vmem:[%s592_s2 + $0x20] sm:$0xff] %v165_v50  ;;  %287 = vst [vmem:[%s592_s2 + $0x60] sm:$0xff] %v205_v51 }
 0x103   :  { %v370_v52 = vpop.f32.mrb[6].mxu0  ;;  %v382_v53 = vpop.f32.mrb[6].mxu1 }
 0x104   :  { %282 = vst [vmem:[%s592_s2 + $0x38] sm:$0xff] %v370_v52  ;;  %290 = vst [vmem:[%s592_s2 + $0x78] sm:$0xff] %v382_v53  ;;  %v175_v54 = vpop.f32.mrb[7].mxu0  ;;  %v215_v55 = vpop.f32.mrb[7].mxu1 }
 0x105   :  { %281 = vst [vmem:[%s592_s2 + $0x30] sm:$0xff] %v175_v54  ;;  %289 = vst [vmem:[%s592_s2 + $0x70] sm:$0xff] %v215_v55 }

</bundles_post_ra>
